<compile_context>
chip_gen: v6e
topology: v6e:2x2x1
jax: 0.10.0
libtpu: 0.0.40
codegen_flags: <defaults>
</compile_context>

<pallas_src>
import jax
import jax.numpy as jnp
from jax.experimental import pallas as pl
from jax.experimental.pallas import tpu as pltpu

LANE = 128                          # vreg lane width
TARGET_BLOCK_BYTES = 4 * 1024 * 1024   # ~4 MiB per block (byte-based budget)
VMEM_LIMIT_FLOOR = 32 * 1024 * 1024    # raise above v5e's 16 MiB scoped default
VMEM_LIMIT_CAP = 48 * 1024 * 1024      # stay under v7x's 64 MiB physical VMEM


def _lambda_func_kernel(x_ref, o_ref):
    """The LambdaLayer's func (SiLU), computed on one lane-dense VMEM block."""
    x = x_ref[...]
    xf = x.astype(jnp.float32)
    # SiLU: x * sigmoid(x) == x / (1 + exp(-x)).  Exact reciprocal kept so the
    # 1e-5 tolerance holds; this op is mem-bound, so VALU/EUP cost is hidden.
    sig = pl.reciprocal(1.0 + jnp.exp(-xf), approx=False)
    o_ref[...] = (xf * sig).astype(o_ref.dtype)


def _sublane_for(dtype):
    """Dtype-aware sublane alignment: 8 rows f32, 16 bf16, 32 int8/fp8."""
    itemsize = jnp.dtype(dtype).itemsize
    return max(8, 32 // max(1, itemsize))


def _pick_width(total):
    """Largest lane-dense slab width (multiple of 128) that divides total."""
    for w in (8 * LANE, 4 * LANE, 2 * LANE, LANE):
        if total % w == 0:
            return w
    raise AssertionError("caller guarantees total % 128 == 0")


def _run_pallas(x_flat, out_dtype):
    """Run the kernel over a flat, 128-aligned array; returns a flat array."""
    total = x_flat.size
    itemsize = jnp.dtype(out_dtype).itemsize
    sublane = _sublane_for(out_dtype)

    width = _pick_width(total)
    rows = total // width
    x2 = x_flat.reshape(rows, width)

    # Block rows from the BYTE budget, rounded to the dtype's sublane multiple.
    rows_budget = TARGET_BLOCK_BYTES // (width * itemsize)
    max_block_rows = max(sublane, (rows_budget // sublane) * sublane)

    if rows <= max_block_rows:
        if rows >= 2 * sublane:
            # Split into >=2 blocks so both v7x TensorCores participate
            # (dimension_semantics=("parallel",)); negligible cost on 1-TC chips.
            block_rows = pl.cdiv(pl.cdiv(rows, 2), sublane) * sublane
        else:
            # Tiny array: one block equal to the full array (always legal).
            block_rows = rows
    else:
        block_rows = max_block_rows  # multiple of sublane; boundary block masked
    grid = pl.cdiv(rows, block_rows)

    block_bytes = block_rows * width * itemsize
    # in + out, double-buffered, plus slack; clamp to the per-generation-safe cap.
    vmem_limit = min(VMEM_LIMIT_CAP,
                     max(VMEM_LIMIT_FLOOR, int(4 * block_bytes * 1.5)))

    cost = pl.CostEstimate(
        flops=4 * total,                       # neg, add, recip, mul
        transcendentals=total,                 # exp
        bytes_accessed=2 * total * itemsize,   # read + write
    )

    out2 = pl.pallas_call(
        _lambda_func_kernel,
        out_shape=jax.ShapeDtypeStruct((rows, width), out_dtype),
        grid_spec=pltpu.PrefetchScalarGridSpec(
            num_scalar_prefetch=0,
            grid=(grid,),
            in_specs=[pl.BlockSpec((block_rows, width), lambda i: (i, 0))],
            out_specs=pl.BlockSpec((block_rows, width), lambda i: (i, 0)),
        ),
        compiler_params=pltpu.CompilerParams(
            dimension_semantics=("parallel",),
            vmem_limit_bytes=vmem_limit,
        ),
        cost_estimate=cost,
    )(x2)

    return out2.reshape(-1)


def _silu_xla(x):
    xf = x.astype(jnp.float32)
    return (xf * jax.nn.sigmoid(xf)).astype(x.dtype)


def lambda_layer(x):
    """Pallas-backed LambdaLayer forward: returns func(x) with x's shape/dtype."""
    orig_shape = x.shape
    orig_dtype = x.dtype
    total = x.size
    x_flat = jnp.ravel(x)

    if total % LANE != 0:
        # Ragged size: kernel on the 128-aligned prefix, plain XLA on the
        # <128-element tail (avoids a whole-tensor pad + slice HBM round trip).
        main = (total // LANE) * LANE
        tail_out = _silu_xla(x_flat[main:])
        if main == 0:
            # TODO(synk): tensors smaller than one lane stay on plain XLA.
            return tail_out.reshape(orig_shape)
        main_out = _run_pallas(x_flat[:main], orig_dtype)
        return jnp.concatenate([main_out, tail_out]).reshape(orig_shape)

    return _run_pallas(x_flat, orig_dtype).reshape(orig_shape)


def _reference(x):
    xf = x.astype(jnp.float32)
    return (xf * jax.nn.sigmoid(xf)).astype(x.dtype)


if __name__ == "__main__":
    key = jax.random.PRNGKey(0)
    # NCHW input, consistent with the PyTorch conv-style usage of LambdaLayer.
    x = jax.random.normal(key, (2, 4, 16, 16), dtype=jnp.float32)

    out = lambda_layer(x)
    out = jax.block_until_ready(out)

    ref = _reference(x)
    assert out.shape == x.shape and out.dtype == x.dtype
    assert jnp.allclose(out, ref, atol=1e-5, rtol=1e-5), "mismatch vs reference"

    print("KERNEL_OK")
</pallas_src>

<mosaic_0001>
module attributes {stable_mosaic.version = 11 : i64} {
  func.func @_lambda_func_kernel(%arg0: i32, %arg1: memref<2x1024xf32, #tpu.memory_space<vmem>>, %arg2: memref<2x1024xf32, #tpu.memory_space<vmem>>) attributes {dimension_semantics = [#tpu.dimension_semantics<parallel>], iteration_bounds = array<i64: 1>, scalar_prefetch = 0 : i64, scratch_operands = 0 : i64, tpu.core_type = #tpu.core_type<tc>, window_params = [{transform_indices = @transform_0, window_bounds = array<i64: 2, 1024>}, {transform_indices = @transform_1, window_bounds = array<i64: 2, 1024>}]} {
    %c0 = arith.constant 0 : index
    %c0_0 = arith.constant 0 : index
    %0 = vector.load %arg1[%c0, %c0_0] : memref<2x1024xf32, #tpu.memory_space<vmem>>, vector<2x1024xf32>
    %cst = arith.constant 0.000000e+00 : f32
    %1 = vector.broadcast %cst : f32 to vector<2x1024xf32>
    %2 = arith.subf %1, %0 : vector<2x1024xf32>
    %3 = math.exp %2 : vector<2x1024xf32>
    %cst_1 = arith.constant 1.000000e+00 : f32
    %4 = vector.broadcast %cst_1 : f32 to vector<2x1024xf32>
    %5 = arith.addf %4, %3 : vector<2x1024xf32>
    %6 = tpu.reciprocal %5 : vector<2x1024xf32> -> vector<2x1024xf32>
    %7 = arith.mulf %0, %6 : vector<2x1024xf32>
    %c0_2 = arith.constant 0 : index
    %c0_3 = arith.constant 0 : index
    %8 = vector.load %arg2[%c0_2, %c0_3] : memref<2x1024xf32, #tpu.memory_space<vmem>>, vector<2x1024xf32>
    tpu.vector_store %arg2[%c0_2, %c0_3], %7 {strides = array<i32>} : memref<2x1024xf32, #tpu.memory_space<vmem>>, vector<2x1024xf32>,
    return
  }
  func.func @transform_0(%arg0: i32) -> (i32, i32) {
    %c0_i32 = arith.constant 0 : i32
    %c0_i32_0 = arith.constant 0 : i32
    return %arg0, %c0_i32 : i32, i32
  }
  func.func @transform_1(%arg0: i32) -> (i32, i32) {
    %c0_i32 = arith.constant 0 : i32
    %c0_i32_0 = arith.constant 0 : i32
    return %arg0, %c0_i32 : i32, i32
  }
}

</mosaic_0001>

<bundles_post_ra>
// kernel: tpu_custom_call.1
= control target key start
LH: loop header
LB: loop body
LE: loop exit
PB: predicated region body
PF: predicated region fallthrough
CT: control target
= control target key end

     0   :  { %6 = vsyncpa [#allocation3], 0  ;;  %s124_s0 = inlined_call_operand.hbm [shape: f32[2,1024], index: 0, kind: input, shape index: {}]   ;;  %s125_s1 = inlined_call_operand.hbm [shape: f32[2,1024], index: 1, kind: output, shape index: {}]  }
   0x1   :  { %7 = vsyncpa [#allocation4], 0  ;;  %s106_s6 = smov [#allocation2]  }
   0x2   :  { %s14_s7 = sshll.u32 %s106_s6, 4  ;;  %s15_s7 = int_to_ptr.vmem [resolvable:$true] %s14_s7 }
   0x3   :  { %s70_s8 = scalar_lea.vmem %s15_s7, 256  ;;  %p75_p1 = scmp.lt.s32.totalorder %s15_s7, %s15_s7 }
   0x4   :  { %p71_p0 = scmp.ne.s32.totalorder %s15_s7, %s70_s8  ;;  %p76_p2 = scmp.lt.s32.totalorder %s70_s8, %s70_s8 }
   0x6   :  { %p77_p3 = por %p76_p2, %p75_p1 }
   0x8   :  { %p78_p4 = pnand %p77_p3, %p71_p0 }
   0xa   :  { %81 = shalt.err (!%p78_p4)
}
   0xb   :  { %17 = dma.hbm_to_vmem [thread:$0]  %s124_s0, 256, %s15_s7, [#allocation3]  }
   0xc   :  { %102 = dma.done.wait [#allocation3], 256  }
   0xd   :  { %103 = vsyncadd [#allocation3], 4294967040  ;;  %v21_v0 = vld [vmem:[#allocation2] sm:$0xff]  ;;  %v22_v1 = vld [vmem:[#allocation2 + $0x8] sm:$0xff]  ;;  %s107_s11 = smov [#allocation5]  }
   0xe   :  { %v23_v2 = vsub.f32 0.0, %v21_v0  ;;  %v24_v3 = vsub.f32 0.0, %v22_v1  ;;  %s43_s12 = sshll.u32 %s107_s11, 4  ;;  %s44_s12 = int_to_ptr.vmem [resolvable:$true] %s43_s12 }
   0xf   :  { %s82_s0 = scalar_lea.vmem %s44_s12, 256  ;;  %p87_p6 = scmp.lt.s32.totalorder %s44_s12, %s44_s12 }
  0x10   :  { %v25_v4 = vmul.f32 1.442695, %v23_v2  ;;  %v27_v5 = vmul.f32 1.442695, %v24_v3  ;;  %p83_p5 = scmp.ne.s32.totalorder %s44_s12, %s82_s0  ;;  %p88_p7 = scmp.lt.s32.totalorder %s82_s0, %s82_s0 }
  0x12   :  { %54 = vpow2.f32 %v25_v4  ;;  %p89_p8 = por %p88_p7, %p87_p6 }
  0x13   :  { %56 = vpow2.f32 %v27_v5 }
  0x14   :  { %p90_p9 = pnand %p89_p8, %p83_p5 }
  0x1f   :  { %v55_v6 = vpop.eup %54 }
  0x20   :  { %v57_v7 = vpop.eup %56  ;;  %v29_v8 = vadd.f32 1.0, %v55_v6 }
  0x21   :  { %v30_v9 = vadd.f32 1.0, %v57_v7 }
  0x22   :  { %58 = vrcp.f32 %v29_v8 }
  0x23   :  { %60 = vrcp.f32 %v30_v9 }
  0x2f   :  { %v59_v10 = vpop.eup %58 }
  0x30   :  { %v61_v11 = vpop.eup %60  ;;  %v33_v12 = vmul.f32 %v59_v10, %v21_v0 }
  0x31   :  { %v34_v13 = vmul.f32 %v61_v11, %v22_v1 }
  0x32   :  { %35 = vst [vmem:[#allocation5] sm:$0xff] %v33_v12 }
  0x33   :  { %36 = vst [vmem:[#allocation5 + $0x8] sm:$0xff] %v34_v13 }
  0x34   :  { %93 = shalt.err (!%p90_p9)
}
  0x35   :  { %46 = dma.vmem_to_hbm [thread:$0]  %s44_s12, 256, %s125_s1, [#allocation4]  }
  0x36   :  { %104 = dma.done.wait [#allocation4], 256  }
  0x37   :  { %105 = vsyncadd [#allocation4], 4294967040 }
  0x38   :  { %50 = vsyncpa [#allocation3], 1 }
  0x39   :  { %51 = vsyncpa [#allocation4], 1 }

</bundles_post_ra>
